<compile_context>
chip_gen: v7x
topology: tpu7x:2x2x1
jax: 0.10.0
libtpu: 0.0.40
codegen_flags: <defaults>
</compile_context>

<pallas_src>
import functools

import jax
import jax.numpy as jnp
from jax import lax
from jax.experimental import pallas as pl
from jax.experimental.pallas import tpu as pltpu


_LANES = 128
_RAGGED_MIN_ELEMS = 65536      # below this a pad copy is negligible


@functools.lru_cache(maxsize=1)
def _per_buffer_budget():
    """Per-input-buffer VMEM budget in bytes (generation dependent)."""
    budget = 1 << 20                       # 1 MiB on v5e / v6e
    try:
        kind = jax.devices()[0].device_kind.lower()
        if "v7" in kind or "7x" in kind:
            budget = 4 << 20               # v7x: faster HBM, amortize step overhead
    except Exception:
        pass
    return budget


def _plan_2d_view(shape, n, max_itemsize, budget):
    """Choose a zero-copy 2-D (R, C) view of the flattened input.

    Returns ((R, C), pad).  pad > 0 only for ragged shapes with no usable
    trailing-dim factorisation (fallback: flatten + zero pad to C = 128).
    """
    if n % _LANES == 0:
        return (n // _LANES, _LANES), 0
    if n >= _RAGGED_MIN_ELEMS:
        c = 1
        for d in reversed(shape):
            c *= int(d)
            if c >= n:                      # R == 1 view: skip (poor sublane layout)
                break
            if c < 100:                     # too narrow -> heavy lane padding
                continue
            cpad = -(-c // _LANES) * _LANES
            if (cpad / c <= 1.35 and n // c >= 64
                    and 8 * cpad * max_itemsize <= budget):
                return (n // c, c), 0
    # TODO(synk): ragged flat vectors with no trailing factor still pay one
    # HBM pad copy; a manual-DMA 1-D path could remove it.
    pad = (-n) % 1024
    return ((n + pad) // _LANES, _LANES), pad


# ----------------------------------------------------------------------------
# Elementwise reduction kernel: per-block partial sums of (A-B)^2 or |A-B|.
# Output block is a lane/sublane-dense (acc_rows, C) f32 accumulator, resident
# across the inner ("arbitrary") axis; one partial slab per outer ("parallel")
# index so both v7x TensorCores own independent accumulators.
# ----------------------------------------------------------------------------
def _diff_reduce_kernel(a_ref, b_ref, out_ref, *, use_abs, tile_r, acc_rows,
                        n_inner, valid_rows, mask_first):
    o = pl.program_id(0)
    i = pl.program_id(1)
    bi = o * n_inner + i

    @pl.when(i == 0)
    def _():
        out_ref[...] = jnp.zeros_like(out_ref)

    def accumulate(apply_mask):
        d = a_ref[...].astype(jnp.float32) - b_ref[...].astype(jnp.float32)
        if apply_mask:
            row = bi * tile_r + lax.broadcasted_iota(jnp.int32, d.shape, 0)
            d = jnp.where(row < valid_rows, d, 0.0)
        dd = jnp.abs(d) if use_abs else d * d
        # Leading-axis split at multiples of acc_rows (>=8) is tile aligned,
        # so the reshape is free; sum(axis=0) is pure VALU with acc_rows/8-way
        # ILP instead of a single-vreg serial add chain.
        out_ref[...] += dd.reshape(-1, acc_rows, d.shape[1]).sum(axis=0)

    if mask_first is None:                  # static: no ragged/phantom blocks
        accumulate(False)
    else:
        @pl.when(bi < mask_first)           # interior blocks: unmasked fast path
        def _():
            accumulate(False)

        @pl.when(bi >= mask_first)          # partial last block / phantom slots
        def _():
            accumulate(True)


def _diff_mean(a, b, use_abs):
    a = jnp.asarray(a)
    b = jnp.asarray(b)
    assert a.shape == b.shape, "elementwise losses require matching shapes"
    n = a.size
    budget = _per_buffer_budget()
    max_isz = max(a.dtype.itemsize, b.dtype.itemsize)

    (R, C), pad = _plan_2d_view(a.shape, n, max_isz, budget)
    if pad:
        a = jnp.pad(a.reshape(-1), (0, pad))
        b = jnp.pad(b.reshape(-1), (0, pad))
    a2 = a.reshape(R, C)
    b2 = b.reshape(R, C)

    cpad = -(-C // _LANES) * _LANES
    if R < 8:
        tile_r, acc_rows = R, R
    else:
        cap = max(8, budget // (cpad * max_isz))   # rows per buffer within budget
        acc_rows = 32 if (R >= 32 and cap >= 32) else 8
        tile_r = min(R, cap)
        tile_r = max(acc_rows, (tile_r // acc_rows) * acc_rows)

    n_blocks = -(-R // tile_r)
    n_outer = 2 if n_blocks >= 2 else 1            # partials per TC (v7x megacore)
    n_inner = -(-n_blocks // n_outer)
    total_slots = n_outer * n_inner
    if R % tile_r != 0:
        mask_first = n_blocks - 1                  # partial last block (+ phantoms)
    elif total_slots > n_blocks:
        mask_first = n_blocks                      # only rounded-up phantom slots
    else:
        mask_first = None

    def in_map(o, i):
        # Phantom slots re-read the last real block; their rows are masked to 0.
        return (jnp.minimum(o * n_inner + i, n_blocks - 1), 0)

    kern = functools.partial(
        _diff_reduce_kernel, use_abs=use_abs, tile_r=tile_r, acc_rows=acc_rows,
        n_inner=n_inner, valid_rows=R, mask_first=mask_first)

    out_rows = n_outer * acc_rows
    cost = pl.CostEstimate(
        flops=3 * n, transcendentals=0,
        bytes_accessed=int(a2.size * a2.dtype.itemsize
                           + b2.size * b2.dtype.itemsize + out_rows * C * 4))

    partials = pl.pallas_call(
        kern,
        out_shape=jax.ShapeDtypeStruct((out_rows, C), jnp.float32),
        grid_spec=pltpu.PrefetchScalarGridSpec(
            num_scalar_prefetch=0,
            grid=(n_outer, n_inner),
            in_specs=[pl.BlockSpec((tile_r, C), in_map),
                      pl.BlockSpec((tile_r, C), in_map)],
            out_specs=pl.BlockSpec((acc_rows, C), lambda o, i: (o, 0)),
        ),
        compiler_params=pltpu.CompilerParams(
            dimension_semantics=("parallel", "arbitrary")),
        cost_estimate=cost,
    )(a2, b2)
    return jnp.sum(partials) / jnp.float32(n)


# ----------------------------------------------------------------------------
# Cross-entropy kernel: batch tiled on the grid, classes on the lane axis.
# Per-outer (acc_rows, 1) resident accumulator -> no per-step scalar XLU reduce.
# ----------------------------------------------------------------------------
def _ce_kernel(logits_ref, tgt_ref, out_ref, *, soft, tn, acc_rows, n_inner,
               n_valid, mask_rows):
    o = pl.program_id(0)
    i = pl.program_id(1)
    bi = o * n_inner + i

    @pl.when(i == 0)
    def _():
        out_ref[...] = jnp.zeros_like(out_ref)

    x = logits_ref[...].astype(jnp.float32)                       # (tn, C)
    if mask_rows:
        # Rows past N (partial last block / phantom slots) read padded garbage:
        # zero the logits before exp (no NaN/Inf) and zero the row losses.
        rows = bi * tn + lax.broadcasted_iota(jnp.int32, x.shape, 0)
        valid = rows < n_valid
        x = jnp.where(valid, x, 0.0)
    m = jnp.max(x, axis=-1, keepdims=True)
    lse = jnp.log(jnp.sum(jnp.exp(x - m), axis=-1, keepdims=True)) + m
    if soft:
        t = tgt_ref[...].astype(jnp.float32)                      # (tn, C)
        if mask_rows:
            t = jnp.where(valid, t, 0.0)
        loss = jnp.sum(t * (lse - x), axis=-1, keepdims=True)     # (tn, 1)
    else:
        cls = lax.broadcasted_iota(jnp.int32, x.shape, 1)
        picked = jnp.sum(jnp.where(cls == tgt_ref[...], x, 0.0),
                         axis=-1, keepdims=True)
        loss = lse - picked                                       # (tn, 1)
        if mask_rows:
            loss = jnp.where(valid[:, :1], loss, 0.0)
    # Sublane fold into the dense resident accumulator (VALU only).
    out_ref[...] += loss.reshape(-1, acc_rows, 1).sum(axis=0)


def _cross_entropy(inA, inB):
    inA = jnp.asarray(inA)
    inB = jnp.asarray(inB)
    soft = (inA.shape == inB.shape)        # torch compares PRE-squeeze shapes
    logits = jnp.squeeze(inA)
    tgt = jnp.squeeze(inB)

    if logits.ndim == 1:                   # single sample -> (1, C)
        logits = logits[None, :]
        tgt = tgt[None, :] if soft else tgt.reshape(1)
    # TODO(synk): nn.CrossEntropyLoss also supports (N, C, d1, ...) spatial
    # targets, weight/ignore_index/label_smoothing kwargs, and very large C
    # (would need online-LSE class tiling); only the (N, C) layout used by
    # nnodely is implemented here.
    assert logits.ndim == 2, "cross_entropy expects logits squeezable to (N, C)"
    N, C = logits.shape

    # VMEM-aware batch tile: 2 pipeline buffers per input, lane-padded C.
    budget = 8 << 20
    cpad = -(-C // _LANES) * _LANES
    per_row = cpad * logits.dtype.itemsize + (cpad * tgt.dtype.itemsize
                                              if soft else 512)
    tn_cap = max(8, (budget // (2 * per_row)) // 8 * 8)
    tn_cap = min(tn_cap, 1024)
    if N < 8:
        tn, acc_rows = N, N
    else:
        tn = min(tn_cap, (N // 8) * 8)
        acc_rows = 8
    grid_n = -(-N // tn)
    n_outer = 2 if grid_n >= 2 else 1      # both v7x TensorCores get work
    n_inner = -(-grid_n // n_outer)
    mask_rows = (n_outer * n_inner * tn != N)

    def in_map(o, i):
        return (jnp.minimum(o * n_inner + i, grid_n - 1), 0)

    if soft:
        targets = tgt                      # kernel casts to f32 in-vreg
        tgt_spec = pl.BlockSpec((tn, C), in_map)
    else:
        targets = tgt.astype(jnp.int32).reshape(N, 1)
        tgt_spec = pl.BlockSpec((tn, 1), in_map)

    kern = functools.partial(_ce_kernel, soft=soft, tn=tn, acc_rows=acc_rows,
                             n_inner=n_inner, n_valid=N, mask_rows=mask_rows)
    cost = pl.CostEstimate(
        flops=6 * N * C, transcendentals=N * C,
        bytes_accessed=int(logits.size * logits.dtype.itemsize
                           + targets.size * targets.dtype.itemsize
                           + n_outer * acc_rows * 4))

    partials = pl.pallas_call(
        kern,
        out_shape=jax.ShapeDtypeStruct((n_outer * acc_rows, 1), jnp.float32),
        grid_spec=pltpu.PrefetchScalarGridSpec(
            num_scalar_prefetch=0,
            grid=(n_outer, n_inner),
            in_specs=[pl.BlockSpec((tn, C), in_map), tgt_spec],
            out_specs=pl.BlockSpec((acc_rows, 1), lambda o, i: (o, 0)),
        ),
        compiler_params=pltpu.CompilerParams(
            dimension_semantics=("parallel", "arbitrary")),
        cost_estimate=cost,
    )(logits, targets)
    return jnp.sum(partials) / jnp.float32(N)


# ----------------------------------------------------------------------------
# CustomLoss wrapper (mirrors the PyTorch module's forward).
# ----------------------------------------------------------------------------
AVAILABLE_LOSSES = ("mse", "rmse", "mae", "cross_entropy")


def custom_loss(inA, inB, loss_type="mse"):
    # TODO(synk): the original module also accepts a callable loss_type; only
    # the named losses are implemented as Pallas kernels.
    assert loss_type in AVAILABLE_LOSSES, f"loss {loss_type} not available"
    if loss_type == "cross_entropy":
        return _cross_entropy(inA, inB)
    if loss_type == "mae":
        return _diff_mean(inA, inB, use_abs=True)
    res = _diff_mean(inA, inB, use_abs=False)   # mse / rmse
    if loss_type == "rmse":
        res = jnp.sqrt(res)
    return res


# ----------------------------------------------------------------------------
# Demo / self-check.
# ----------------------------------------------------------------------------
if __name__ == "__main__":
    key = jax.random.PRNGKey(0)
    keys = jax.random.split(key, 10)
    checks = []

    # 1) Small aligned NCHW-style elementwise losses (single-block path).
    a = jax.random.normal(keys[0], (2, 4, 16, 16), jnp.float32)
    b = jax.random.normal(keys[1], (2, 4, 16, 16), jnp.float32)
    ref_mse = jnp.mean((a - b) ** 2)
    checks += [
        (custom_loss(a, b, "mse"), ref_mse, 1e-5),
        (custom_loss(a, b, "rmse"), jnp.sqrt(ref_mse), 1e-5),
        (custom_loss(a, b, "mae"), jnp.mean(jnp.abs(a - b)), 1e-5),
    ]

    # 2) bf16 inputs: kernel casts in-vreg, byte-budgeted tiles double the rows.
    abf = a.astype(jnp.bfloat16)
    bbf = b.astype(jnp.bfloat16)
    ref_mae_bf = jnp.mean(
        jnp.abs(abf.astype(jnp.float32) - bbf.astype(jnp.float32)))
    checks.append((custom_loss(abf, bbf, "mae"), ref_mae_bf, 1e-5))

    # 3) Ragged 2-D input: zero-copy trailing-factor view (C=100), multi-block
    #    grid, per-core partials, pl.when-gated mask on the partial last block.
    a2 = jax.random.normal(keys[2], (1201, 100), jnp.float32)
    b2 = jax.random.normal(keys[3], (1201, 100), jnp.float32)
    checks.append((custom_loss(a2, b2, "mse"), jnp.mean((a2 - b2) ** 2), 2e-4))
    checks.append((custom_loss(a2, b2, "mae"), jnp.mean(jnp.abs(a2 - b2)), 2e-4))

    # 4) Ragged flat vector with no trailing factor: padded fallback path.
    a3 = jax.random.normal(keys[4], (70403,), jnp.float32)
    b3 = jax.random.normal(keys[5], (70403,), jnp.float32)
    checks.append((custom_loss(a3, b3, "mse"), jnp.mean((a3 - b3) ** 2), 2e-4))

    # 5) Cross-entropy: integer class-index targets with squeezable dims.
    logits = jax.random.normal(keys[6], (16, 32), jnp.float32)
    tgt_idx = jax.random.randint(keys[7], (16, 1, 1), 0, 32)
    lse = jax.scipy.special.logsumexp(logits, axis=-1)
    ref_ce = jnp.mean(lse - logits[jnp.arange(16), jnp.squeeze(tgt_idx)])
    checks.append((custom_loss(logits, tgt_idx, "cross_entropy"), ref_ce, 1e-5))

    # 6) Cross-entropy: soft (probability) targets, same-shape branch.
    soft_tgt = jax.nn.softmax(jax.random.normal(keys[8], (16, 32), jnp.float32), -1)
    ref_ce_soft = jnp.mean(jnp.sum(-soft_tgt * (logits - lse[:, None]), axis=-1))
    checks.append(
        (custom_loss(logits, soft_tgt, "cross_entropy"), ref_ce_soft, 1e-5))

    # 7) Cross-entropy with a ragged batch: masked last block + 2-way outer split.
    logits2 = jax.random.normal(keys[9], (300, 48), jnp.float32)
    tgt2 = jax.random.randint(keys[0], (300,), 0, 48)
    lse2 = jax.scipy.special.logsumexp(logits2, axis=-1)
    ref_ce2 = jnp.mean(lse2 - logits2[jnp.arange(300), tgt2])
    checks.append((custom_loss(logits2, tgt2, "cross_entropy"), ref_ce2, 1e-4))

    soft2 = jax.nn.softmax(jax.random.normal(keys[1], (300, 48), jnp.float32), -1)
    ref_ce2s = jnp.mean(jnp.sum(-soft2 * (logits2 - lse2[:, None]), axis=-1))
    checks.append((custom_loss(logits2, soft2, "cross_entropy"), ref_ce2s, 1e-4))

    ok = True
    for got, ref, tol in checks:
        got = jax.block_until_ready(got)
        if not bool(jnp.allclose(got, ref, rtol=tol, atol=tol)):
            ok = False
            print("MISMATCH", float(got), float(ref))

    if ok:
        print("KERNEL_OK")
</pallas_src>

<mosaic_0001>
module attributes {stable_mosaic.version = 11 : i64} {
  func.func @_diff_reduce_kernel(%arg0: i32, %arg1: i32, %arg2: memref<16x128xf32, #tpu.memory_space<vmem>>, %arg3: memref<16x128xf32, #tpu.memory_space<vmem>>, %arg4: memref<8x128xf32, #tpu.memory_space<vmem>>) attributes {dimension_semantics = [#tpu.dimension_semantics<parallel>, #tpu.dimension_semantics<arbitrary>], iteration_bounds = array<i64: 1, 1>, scalar_prefetch = 0 : i64, scratch_operands = 0 : i64, tpu.core_type = #tpu.core_type<tc>, window_params = [{transform_indices = @transform_0, window_bounds = array<i64: 16, 128>}, {transform_indices = @transform_1, window_bounds = array<i64: 16, 128>}, {transform_indices = @transform_2, window_bounds = array<i64: 8, 128>}]} {
    %c0_i32 = arith.constant 0 : i32
    %0 = arith.cmpi eq, %arg1, %c0_i32 : i32
    %1 = arith.extui %0 : i1 to i32
    %c0_i32_0 = arith.constant 0 : i32
    %2 = arith.cmpi ne, %1, %c0_i32_0 : i32
    scf.if %2 {
      %cst_8 = arith.constant 0.000000e+00 : f32
      %12 = vector.broadcast %cst_8 : f32 to vector<8x128xf32>
      %c0_9 = arith.constant 0 : index
      %c0_10 = arith.constant 0 : index
      %13 = vector.load %arg4[%c0_9, %c0_10] : memref<8x128xf32, #tpu.memory_space<vmem>>, vector<8x128xf32>
      tpu.vector_store %arg4[%c0_9, %c0_10], %12 {strides = array<i32>} : memref<8x128xf32, #tpu.memory_space<vmem>>, vector<8x128xf32>,
    } else {
    }
    %c0 = arith.constant 0 : index
    %c0_1 = arith.constant 0 : index
    %3 = vector.load %arg2[%c0, %c0_1] : memref<16x128xf32, #tpu.memory_space<vmem>>, vector<16x128xf32>
    %c0_2 = arith.constant 0 : index
    %c0_3 = arith.constant 0 : index
    %4 = vector.load %arg3[%c0_2, %c0_3] : memref<16x128xf32, #tpu.memory_space<vmem>>, vector<16x128xf32>
    %5 = arith.subf %3, %4 : vector<16x128xf32>
    %6 = arith.mulf %5, %5 : vector<16x128xf32>
    %c0_4 = arith.constant 0 : index
    %c0_5 = arith.constant 0 : index
    %7 = vector.load %arg4[%c0_4, %c0_5] : memref<8x128xf32, #tpu.memory_space<vmem>>, vector<8x128xf32>
    %8 = vector.shape_cast %6 : vector<16x128xf32> to vector<2x8x128xf32>
    %cst = arith.constant dense<0.000000e+00> : vector<8x128xf32>
    %9 = vector.multi_reduction <add>, %8, %cst [0] : vector<2x8x128xf32> to vector<8x128xf32>
    %10 = arith.addf %7, %9 : vector<8x128xf32>
    %c0_6 = arith.constant 0 : index
    %c0_7 = arith.constant 0 : index
    %11 = vector.load %arg4[%c0_6, %c0_7] : memref<8x128xf32, #tpu.memory_space<vmem>>, vector<8x128xf32>
    tpu.vector_store %arg4[%c0_6, %c0_7], %10 {strides = array<i32>} : memref<8x128xf32, #tpu.memory_space<vmem>>, vector<8x128xf32>,
    return
  }
  func.func @transform_0(%arg0: i32, %arg1: i32) -> (i32, i32) {
    %c1_i32 = arith.constant 1 : i32
    %0 = arith.muli %arg0, %c1_i32 : i32
    %1 = arith.addi %0, %arg1 : i32
    %c0_i32 = arith.constant 0 : i32
    %2 = arith.minsi %1, %c0_i32 : i32
    %c0_i32_0 = arith.constant 0 : i32
    %c0_i32_1 = arith.constant 0 : i32
    return %2, %c0_i32_0 : i32, i32
  }
  func.func @transform_1(%arg0: i32, %arg1: i32) -> (i32, i32) {
    %c1_i32 = arith.constant 1 : i32
    %0 = arith.muli %arg0, %c1_i32 : i32
    %1 = arith.addi %0, %arg1 : i32
    %c0_i32 = arith.constant 0 : i32
    %2 = arith.minsi %1, %c0_i32 : i32
    %c0_i32_0 = arith.constant 0 : i32
    %c0_i32_1 = arith.constant 0 : i32
    return %2, %c0_i32_0 : i32, i32
  }
  func.func @transform_2(%arg0: i32, %arg1: i32) -> (i32, i32) {
    %c0_i32 = arith.constant 0 : i32
    %c0_i32_0 = arith.constant 0 : i32
    return %arg0, %c0_i32 : i32, i32
  }
}

</mosaic_0001>

<bundles_post_ra>
// kernel: tpu_custom_call.1
= control target key start
LH: loop header
LB: loop body
LE: loop exit
PB: predicated region body
PF: predicated region fallthrough
CT: control target
= control target key end

     0   :  { %7 = vsyncpa [#allocation3], 0  ;;  %s231_s0 = inlined_call_operand.hbm [shape: f32[16,128], index: 0, kind: input, shape index: {}]   ;;  %s232_s1 = inlined_call_operand.hbm [shape: f32[16,128], index: 1, kind: input, shape index: {}]   ;;  %s233_s2 = inlined_call_operand.hbm [shape: f32[8,128], index: 2, kind: output, shape index: {}]  }
   0x1   :  { %8 = vsyncpa [#allocation6], 0 }
   0x2   :  { %9 = vsyncpa [#allocation4], 0  ;;  %s175_s9 = smov [#allocation2]   ;;  %s103_s13 = scalar_lea.hbm %s231_s0, 256 }
   0x3   :  { %s21_s10 = sshll.u32 %s175_s9, 4  ;;  %p104_p0 = scmp.ne.s32.totalorder %s231_s0, %s103_s13  ;;  %s22_s10 = int_to_ptr.vmem [resolvable:$true] %s21_s10 }
   0x4   :  { %p107_p1 = scmp.lt.u32.totalorder %s103_s13, %s231_s0 }
   0x6   :  { %p109_p2 = pnand %p107_p1, %p104_p0 }
   0x8   :  { %112 = shalt.err (!%p109_p2)
}
   0x9   :  { %s113_s18 = scalar_lea.vmem %s22_s10, 256  ;;  %p118_p4 = scmp.lt.s32.totalorder %s22_s10, %s22_s10 }
   0xa   :  { %p114_p3 = scmp.ne.s32.totalorder %s22_s10, %s113_s18  ;;  %p119_p5 = scmp.lt.s32.totalorder %s113_s18, %s113_s18 }
   0xc   :  { %p120_p6 = por %p119_p5, %p118_p4 }
   0xe   :  { %p121_p7 = pnand %p120_p6, %p114_p3 }
  0x10   :  { %124 = shalt.err (!%p121_p7)
}
  0x11   :  { %s176_s19 = smov 128   ;;  %s177_s20 = smov 8  }
  0x12   :  { %27 = dma.hbm_to_vmem [thread:$0]  %s231_s0, 256, %s22_s10, [#allocation3], %s176_s19, %s176_s19, %s177_s20  }
  0x13   :  { %s178_s23 = smov [#allocation5]   ;;  %s125_s27 = scalar_lea.hbm %s232_s1, 256 }
  0x14   :  { %s39_s24 = sshll.u32 %s178_s23, 4  ;;  %p126_p8 = scmp.ne.s32.totalorder %s232_s1, %s125_s27  ;;  %s40_s24 = int_to_ptr.vmem [resolvable:$true] %s39_s24 }
  0x15   :  { %p129_p9 = scmp.lt.u32.totalorder %s125_s27, %s232_s1 }
  0x17   :  { %p131_p10 = pnand %p129_p9, %p126_p8 }
  0x19   :  { %134 = shalt.err (!%p131_p10)
}
  0x1a   :  { %s135_s4 = scalar_lea.vmem %s40_s24, 256  ;;  %p140_p12 = scmp.lt.s32.totalorder %s40_s24, %s40_s24 }
  0x1b   :  { %p136_p11 = scmp.ne.s32.totalorder %s40_s24, %s135_s4  ;;  %p141_p13 = scmp.lt.s32.totalorder %s135_s4, %s135_s4 }
  0x1d   :  { %p142_p0 = por %p141_p13, %p140_p12 }
  0x1f   :  { %p143_p1 = pnand %p142_p0, %p136_p11 }
  0x21   :  { %146 = shalt.err (!%p143_p1)
}
  0x22   :  { %45 = dma.hbm_to_vmem [thread:$0]  %s232_s1, 256, %s40_s24, [#allocation6], %s176_s19, %s176_s19, %s177_s20  }
  0x23   :  { %169 = dma.done.wait [#allocation3], 256  }
  0x24   :  { %170 = vsyncadd [#allocation3], 4294967040 }
  0x25   :  { %171 = dma.done.wait [#allocation6], 256  }
  0x26   :  { %172 = vsyncadd [#allocation6], 4294967040  ;;  %v65_v0 = vld [vmem:[#allocation2] sm:$0xff]  ;;  %v66_v1 = vld [vmem:[#allocation2 + $0x8] sm:$0xff]  ;;  %s179_s6 = smov [#allocation7]  }
  0x27   :  { %v67_v2 = vld [vmem:[#allocation5] sm:$0xff]  ;;  %v68_v3 = vld [vmem:[#allocation5 + $0x8] sm:$0xff]  ;;  %s83_s7 = sshll.u32 %s179_s6, 4  ;;  %s84_s7 = int_to_ptr.vmem [resolvable:$true] %s83_s7 }
  0x28   :  { %v69_v4 = vsub.f32 %v65_v0, %v67_v2  ;;  %v70_v5 = vsub.f32 %v66_v1, %v68_v3  ;;  %s147_s8 = scalar_lea.vmem %s84_s7, 128  ;;  %p152_p3 = scmp.lt.s32.totalorder %s84_s7, %s84_s7 }
  0x29   :  { %p148_p2 = scmp.ne.s32.totalorder %s84_s7, %s147_s8  ;;  %p153_p4 = scmp.lt.s32.totalorder %s147_s8, %s147_s8 }
  0x2a   :  { %v71_v6 = vmul.f32 %v69_v4, %v69_v4  ;;  %v72_v7 = vmul.f32 %v70_v5, %v70_v5 }
  0x2b   :  { %p154_p5 = por %p153_p4, %p152_p3 }
  0x2c   :  { %v74_v8 = vadd.f32 %v72_v7, %v71_v6 }
  0x2d   :  { %p155_p6 = pnand %p154_p5, %p148_p2 }
  0x2e   :  { %76 = vst [vmem:[#allocation7] sm:$0xff] %v74_v8 }
  0x2f   :  { %158 = shalt.err (!%p155_p6)
}
  0x30   :  { %s159_s10 = scalar_lea.hbm %s233_s2, 128 }
  0x31   :  { %p160_p7 = scmp.ne.s32.totalorder %s233_s2, %s159_s10  ;;  %p163_p8 = scmp.lt.u32.totalorder %s159_s10, %s233_s2 }
  0x33   :  { %p165_p9 = pnand %p163_p8, %p160_p7 }
  0x35   :  { %168 = shalt.err (!%p165_p9)
}
  0x36   :  { %86 = dma.vmem_to_hbm [thread:$0]  %s84_s7, 128, %s233_s2, [#allocation4]  }
  0x37   :  { %173 = dma.done.wait [#allocation4], 128  }
  0x38   :  { %174 = vsyncadd [#allocation4], 4294967168 }
  0x39   :  { %90 = vsyncpa [#allocation3], 1 }
  0x3a   :  { %91 = vsyncpa [#allocation6], 1 }
  0x3b   :  { %92 = vsyncpa [#allocation4], 1 }

</bundles_post_ra>
